<compile_context>
chip_gen: v7x
topology: tpu7x:2x2x1
jax: 0.10.0
libtpu: 0.0.40
codegen_flags: <defaults>
</compile_context>

<pallas_src>
import functools

import jax
import jax.numpy as jnp
from jax.experimental import pallas as pl
from jax.experimental.pallas import tpu as pltpu


def _round_up(x, m):
    return ((x + m - 1) // m) * m


def channel_attention_kernel(inv_hw, hw_total, needs_mask,
                             x_ref, w1_ref, b1_ref, w2_ref, b2_ref,
                             o_ref, acc_ref):
    # x_ref : (TB, C, T_HW)  native dtype (f32 or bf16)
    # w1_ref: (C, hidden)    f32 (already transposed from PyTorch (out,in))
    # b1_ref: (1, hidden)    f32
    # w2_ref: (hidden, C)    f32
    # b2_ref: (1, C)         f32
    # o_ref : (TB, C)
    # acc_ref: (TB, C, 128)  f32 scratch, persists across the HW grid axis
    s = pl.program_id(1)

    @pl.when(s == 0)
    def _init():
        acc_ref[...] = jnp.zeros_like(acc_ref)

    x = x_ref[...]                       # (TB, C, T_HW)
    tb, c, t_hw = x.shape
    n_chunks = t_hw // 128               # T_HW is always a multiple of 128

    if needs_mask:
        # Hoisted base iota; only the scalar offset changes per chunk.
        base = jax.lax.broadcasted_iota(jnp.int32, (tb, c, 128), 2)
        tile_start = s * t_hw

    part = None
    for k in range(n_chunks):            # static unroll, VPU adds only
        chunk = x[:, :, k * 128:(k + 1) * 128].astype(jnp.float32)
        if needs_mask:
            pos = base + (tile_start + k * 128)
            chunk = jnp.where(pos < hw_total, chunk, 0.0)
        part = chunk if part is None else part + chunk
    acc_ref[...] += part

    @pl.when(s == pl.num_programs(1) - 1)
    def _finalize():
        # Single cross-lane reduce, then mean via multiply (no divide).
        pooled = jnp.sum(acc_ref[...], axis=-1) * inv_hw          # (TB, C) f32
        h = jnp.dot(pooled, w1_ref[...],
                    preferred_element_type=jnp.float32) + b1_ref[...]
        h = jnp.maximum(h, 0.0)                                   # ReLU
        y = jnp.dot(h, w2_ref[...],
                    preferred_element_type=jnp.float32) + b2_ref[...]
        y = jax.nn.sigmoid(y)
        o_ref[...] = y.astype(o_ref.dtype)


def channel_attention(x, w1, b1, w2, b2):
    """x: (B, C, H, W); w1: (C//r, C); b1: (C//r,); w2: (C, C//r); b2: (C,)."""
    B, C, H, W = x.shape
    hidden = w1.shape[0]
    HW = H * W
    itemsize = jnp.dtype(x.dtype).itemsize

    # ---- batch tiling: split only into sublane-aligned tiles, else keep full B.
    TB = B
    for cand in (32, 16, 8):
        if B > cand and B % cand == 0:
            TB = cand
            break
    nb = B // TB

    # ---- H*W tiling: lane-aligned (multiple of 128), sized so double-buffered
    # x tiles stay well inside the scoped VMEM limit on all generations
    # (v7x: 64 MiB physical / 32 MiB default scoped).
    X_TILE_BUDGET = 8 * 1024 * 1024          # bytes per in-flight x tile (x2 buffers)
    MAX_UNROLL_CHUNKS = 32                   # cap the in-kernel 128-lane add chain
    budget_hw = max(128, (X_TILE_BUDGET // max(1, TB * C * itemsize)) // 128 * 128)
    hw_aligned = _round_up(HW, 128)
    T_HW = max(128, min(budget_hw, MAX_UNROLL_CHUNKS * 128, hw_aligned))
    ns = pl.cdiv(HW, T_HW)
    needs_mask = (HW % T_HW) != 0            # partial tail tile -> mask OOB lanes

    x_flat = x.reshape(B, C, HW)             # native dtype; no extra HBM pass
    w1_t = w1.T.astype(jnp.float32)          # (C, hidden)
    b1_2d = b1.reshape(1, hidden).astype(jnp.float32)
    w2_t = w2.T.astype(jnp.float32)          # (hidden, C)
    b2_2d = b2.reshape(1, C).astype(jnp.float32)

    kernel = functools.partial(channel_attention_kernel, 1.0 / HW, HW, needs_mask)

    cost = pl.CostEstimate(
        flops=int(B * C * HW + 4 * B * C * hidden),
        transcendentals=int(B * C),
        bytes_accessed=int(x_flat.size * itemsize
                           + (w1_t.size + b1_2d.size + w2_t.size + b2_2d.size) * 4
                           + B * C * itemsize),
    )

    out = pl.pallas_call(
        kernel,
        out_shape=jax.ShapeDtypeStruct((B, C), x.dtype),
        grid=(nb, ns),                                    # reduction axis last
        in_specs=[
            pl.BlockSpec((TB, C, T_HW), lambda b, s: (b, 0, s)),
            pl.BlockSpec((C, hidden), lambda b, s: (0, 0)),   # weights resident
            pl.BlockSpec((1, hidden), lambda b, s: (0, 0)),
            pl.BlockSpec((hidden, C), lambda b, s: (0, 0)),
            pl.BlockSpec((1, C), lambda b, s: (0, 0)),
        ],
        out_specs=pl.BlockSpec((TB, C), lambda b, s: (b, 0)),
        scratch_shapes=[pltpu.VMEM((TB, C, 128), jnp.float32)],
        compiler_params=pltpu.CompilerParams(
            dimension_semantics=("parallel", "arbitrary"),
            vmem_limit_bytes=32 * 1024 * 1024,
        ),
        cost_estimate=cost,
    )(x_flat, w1_t, b1_2d, w2_t, b2_2d)

    return out.reshape(B, C, 1, 1)


def reference(x, w1, b1, w2, b2):
    B, C, H, W = x.shape
    pooled = jnp.mean(x.astype(jnp.float32), axis=(2, 3))   # (B, C)
    h = jnp.maximum(pooled @ w1.T + b1, 0.0)                 # (B, C//r)
    y = jax.nn.sigmoid(h @ w2.T + b2)                        # (B, C)
    return y.reshape(B, C, 1, 1).astype(x.dtype)


if __name__ == "__main__":
    key = jax.random.PRNGKey(0)
    B, C, H, W = 2, 4, 16, 16
    ratio = 2
    hidden = C // ratio

    kx, kw1, kb1, kw2, kb2 = jax.random.split(key, 5)
    x = jax.random.normal(kx, (B, C, H, W), dtype=jnp.float32)
    # Deterministic parameter init (uniform, PyTorch Linear default scale).
    bound1 = 1.0 / (C ** 0.5)
    bound2 = 1.0 / (hidden ** 0.5)
    w1 = jax.random.uniform(kw1, (hidden, C), minval=-bound1, maxval=bound1)
    b1 = jax.random.uniform(kb1, (hidden,), minval=-bound1, maxval=bound1)
    w2 = jax.random.uniform(kw2, (C, hidden), minval=-bound2, maxval=bound2)
    b2 = jax.random.uniform(kb2, (C,), minval=-bound2, maxval=bound2)

    y = channel_attention(x, w1, b1, w2, b2)
    y = jax.block_until_ready(y)

    y_ref = reference(x, w1, b1, w2, b2)
    assert y.shape == (B, C, 1, 1)
    assert jnp.allclose(y, y_ref, atol=1e-5, rtol=1e-5)
    print("KERNEL_OK")
</pallas_src>

<mosaic_0001>
module attributes {stable_mosaic.version = 11 : i64} {
  func.func @channel_attention_kernel(%arg0: i32, %arg1: i32, %arg2: memref<2x4x256xf32, #tpu.memory_space<vmem>>, %arg3: memref<4x2xf32, #tpu.memory_space<vmem>>, %arg4: memref<1x2xf32, #tpu.memory_space<vmem>>, %arg5: memref<2x4xf32, #tpu.memory_space<vmem>>, %arg6: memref<1x4xf32, #tpu.memory_space<vmem>>, %arg7: memref<2x4xf32, #tpu.memory_space<vmem>>, %arg8: memref<2x4x128xf32, #tpu.memory_space<vmem>>) attributes {dimension_semantics = [#tpu.dimension_semantics<parallel>, #tpu.dimension_semantics<arbitrary>], iteration_bounds = array<i64: 1, 1>, scalar_prefetch = 0 : i64, scratch_operands = 1 : i64, tpu.core_type = #tpu.core_type<tc>, window_params = [{transform_indices = @transform_0, window_bounds = array<i64: 2, 4, 256>}, {pipeline_mode = #tpu.pipeline_mode<synchronous>, transform_indices = @transform_1, window_bounds = array<i64: 4, 2>}, {pipeline_mode = #tpu.pipeline_mode<synchronous>, transform_indices = @transform_2, window_bounds = array<i64: 1, 2>}, {pipeline_mode = #tpu.pipeline_mode<synchronous>, transform_indices = @transform_3, window_bounds = array<i64: 2, 4>}, {pipeline_mode = #tpu.pipeline_mode<synchronous>, transform_indices = @transform_4, window_bounds = array<i64: 1, 4>}, {transform_indices = @transform_5, window_bounds = array<i64: 2, 4>}]} {
    %c0_i32 = arith.constant 0 : i32
    %0 = arith.cmpi eq, %arg1, %c0_i32 : i32
    %1 = arith.extui %0 : i1 to i32
    %c0_i32_0 = arith.constant 0 : i32
    %2 = arith.cmpi ne, %1, %c0_i32_0 : i32
    scf.if %2 {
      %cst = arith.constant 0.000000e+00 : f32
      %13 = vector.broadcast %cst : f32 to vector<2x4x128xf32>
      %c0_11 = arith.constant 0 : index
      %c0_12 = arith.constant 0 : index
      %c0_13 = arith.constant 0 : index
      %14 = vector.load %arg8[%c0_11, %c0_12, %c0_13] : memref<2x4x128xf32, #tpu.memory_space<vmem>>, vector<2x4x128xf32>
      tpu.vector_store %arg8[%c0_11, %c0_12, %c0_13], %13 {strides = array<i32>} : memref<2x4x128xf32, #tpu.memory_space<vmem>>, vector<2x4x128xf32>,
    } else {
    }
    %c0 = arith.constant 0 : index
    %c0_1 = arith.constant 0 : index
    %c0_2 = arith.constant 0 : index
    %3 = vector.load %arg2[%c0, %c0_1, %c0_2] : memref<2x4x256xf32, #tpu.memory_space<vmem>>, vector<2x4x256xf32>
    %4 = vector.extract_strided_slice %3 {offsets = [0, 0, 0], sizes = [2, 4, 128], strides = [1, 1, 1]} : vector<2x4x256xf32> to vector<2x4x128xf32>
    %5 = vector.extract_strided_slice %3 {offsets = [0, 0, 128], sizes = [2, 4, 128], strides = [1, 1, 1]} : vector<2x4x256xf32> to vector<2x4x128xf32>
    %6 = arith.addf %4, %5 : vector<2x4x128xf32>
    %c0_3 = arith.constant 0 : index
    %c0_4 = arith.constant 0 : index
    %c0_5 = arith.constant 0 : index
    %7 = vector.load %arg8[%c0_3, %c0_4, %c0_5] : memref<2x4x128xf32, #tpu.memory_space<vmem>>, vector<2x4x128xf32>
    %8 = arith.addf %7, %6 : vector<2x4x128xf32>
    %c0_6 = arith.constant 0 : index
    %c0_7 = arith.constant 0 : index
    %c0_8 = arith.constant 0 : index
    %9 = vector.load %arg8[%c0_6, %c0_7, %c0_8] : memref<2x4x128xf32, #tpu.memory_space<vmem>>, vector<2x4x128xf32>
    tpu.vector_store %arg8[%c0_6, %c0_7, %c0_8], %8 {strides = array<i32>} : memref<2x4x128xf32, #tpu.memory_space<vmem>>, vector<2x4x128xf32>,
    %c0_i32_9 = arith.constant 0 : i32
    %10 = arith.cmpi eq, %arg1, %c0_i32_9 : i32
    %11 = arith.extui %10 : i1 to i32
    %c0_i32_10 = arith.constant 0 : i32
    %12 = arith.cmpi ne, %11, %c0_i32_10 : i32
    scf.if %12 {
      %c0_11 = arith.constant 0 : index
      %c0_12 = arith.constant 0 : index
      %c0_13 = arith.constant 0 : index
      %13 = vector.load %arg8[%c0_11, %c0_12, %c0_13] : memref<2x4x128xf32, #tpu.memory_space<vmem>>, vector<2x4x128xf32>
      %cst = arith.constant dense<0.000000e+00> : vector<2x4xf32>
      %14 = vector.multi_reduction <add>, %13, %cst [2] : vector<2x4x128xf32> to vector<2x4xf32>
      %cst_14 = arith.constant 3.906250e-03 : f32
      %15 = vector.broadcast %cst_14 : f32 to vector<2x4xf32>
      %16 = arith.mulf %14, %15 : vector<2x4xf32>
      %c0_15 = arith.constant 0 : index
      %c0_16 = arith.constant 0 : index
      %17 = vector.load %arg3[%c0_15, %c0_16] : memref<4x2xf32, #tpu.memory_space<vmem>>, vector<4x2xf32>
      %cst_17 = arith.constant dense<0.000000e+00> : vector<2x2xf32>
      %18 = tpu.matmul %16, %17, %cst_17 {dimension_numbers = #tpu.dot_dimension_numbers<[1], [0], [0], [1], [0, 0, 1, 1], [], []>} : vector<2x4xf32>, vector<4x2xf32>, vector<2x2xf32> -> vector<2x2xf32>
      %c0_18 = arith.constant 0 : index
      %c0_19 = arith.constant 0 : index
      %19 = vector.load %arg4[%c0_18, %c0_19] : memref<1x2xf32, #tpu.memory_space<vmem>>, vector<1x2xf32>
      %20 = vector.broadcast %19 : vector<1x2xf32> to vector<2x2xf32>
      %21 = arith.addf %18, %20 : vector<2x2xf32>
      %cst_20 = arith.constant 0.000000e+00 : f32
      %22 = vector.broadcast %cst_20 : f32 to vector<2x2xf32>
      %23 = arith.maximumf %21, %22 : vector<2x2xf32>
      %c0_21 = arith.constant 0 : index
      %c0_22 = arith.constant 0 : index
      %24 = vector.load %arg5[%c0_21, %c0_22] : memref<2x4xf32, #tpu.memory_space<vmem>>, vector<2x4xf32>
      %cst_23 = arith.constant dense<0.000000e+00> : vector<2x4xf32>
      %25 = tpu.matmul %23, %24, %cst_23 {dimension_numbers = #tpu.dot_dimension_numbers<[1], [0], [0], [1], [0, 0, 1, 1], [], []>} : vector<2x2xf32>, vector<2x4xf32>, vector<2x4xf32> -> vector<2x4xf32>
      %c0_24 = arith.constant 0 : index
      %c0_25 = arith.constant 0 : index
      %26 = vector.load %arg6[%c0_24, %c0_25] : memref<1x4xf32, #tpu.memory_space<vmem>>, vector<1x4xf32>
      %27 = vector.broadcast %26 : vector<1x4xf32> to vector<2x4xf32>
      %28 = arith.addf %25, %27 : vector<2x4xf32>
      %29 = arith.negf %28 : vector<2x4xf32>
      %30 = math.exp %29 : vector<2x4xf32>
      %cst_26 = arith.constant 1.000000e+00 : f32
      %31 = vector.broadcast %cst_26 : f32 to vector<2x4xf32>
      %32 = arith.addf %31, %30 : vector<2x4xf32>
      %33 = arith.divf %31, %32 : vector<2x4xf32>
      %c0_27 = arith.constant 0 : index
      %c0_28 = arith.constant 0 : index
      %34 = vector.load %arg7[%c0_27, %c0_28] : memref<2x4xf32, #tpu.memory_space<vmem>>, vector<2x4xf32>
      tpu.vector_store %arg7[%c0_27, %c0_28], %33 {strides = array<i32>} : memref<2x4xf32, #tpu.memory_space<vmem>>, vector<2x4xf32>,
    } else {
    }
    return
  }
  func.func @transform_0(%arg0: i32, %arg1: i32) -> (i32, i32, i32) {
    %c0_i32 = arith.constant 0 : i32
    %c0_i32_0 = arith.constant 0 : i32
    return %arg0, %c0_i32, %arg1 : i32, i32, i32
  }
  func.func @transform_1(%arg0: i32, %arg1: i32) -> (i32, i32) {
    %c0_i32 = arith.constant 0 : i32
    %c0_i32_0 = arith.constant 0 : i32
    %c0_i32_1 = arith.constant 0 : i32
    return %c0_i32, %c0_i32_0 : i32, i32
  }
  func.func @transform_2(%arg0: i32, %arg1: i32) -> (i32, i32) {
    %c0_i32 = arith.constant 0 : i32
    %c0_i32_0 = arith.constant 0 : i32
    %c0_i32_1 = arith.constant 0 : i32
    return %c0_i32, %c0_i32_0 : i32, i32
  }
  func.func @transform_3(%arg0: i32, %arg1: i32) -> (i32, i32) {
    %c0_i32 = arith.constant 0 : i32
    %c0_i32_0 = arith.constant 0 : i32
    %c0_i32_1 = arith.constant 0 : i32
    return %c0_i32, %c0_i32_0 : i32, i32
  }
  func.func @transform_4(%arg0: i32, %arg1: i32) -> (i32, i32) {
    %c0_i32 = arith.constant 0 : i32
    %c0_i32_0 = arith.constant 0 : i32
    %c0_i32_1 = arith.constant 0 : i32
    return %c0_i32, %c0_i32_0 : i32, i32
  }
  func.func @transform_5(%arg0: i32, %arg1: i32) -> (i32, i32) {
    %c0_i32 = arith.constant 0 : i32
    %c0_i32_0 = arith.constant 0 : i32
    return %arg0, %c0_i32 : i32, i32
  }
}

</mosaic_0001>

<bundles_post_ra>
// kernel: tpu_custom_call.1
= control target key start
LH: loop header
LB: loop body
LE: loop exit
PB: predicated region body
PF: predicated region fallthrough
CT: control target
= control target key end

     0   :  { %10 = vsyncpa [#allocation4], 0  ;;  %s430_s0 = inlined_call_operand.hbm [shape: f32[2,4,256], index: 0, kind: input, shape index: {}]   ;;  %s431_s1 = inlined_call_operand.vmem [shape: f32[4,2], index: 1, kind: input, shape index: {}]   ;;  %s432_s2 = inlined_call_operand.vmem [shape: f32[1,2], index: 2, kind: input, shape index: {}]   ;;  %s433_s3 = inlined_call_operand.vmem [shape: f32[2,4], index: 3, kind: input, shape index: {}]   ;;  %s434_s4 = inlined_call_operand.vmem [shape: f32[1,4], index: 4, kind: input, shape index: {}]   ;;  %s435_s5 = inlined_call_operand.hbm [shape: f32[2,4], index: 5, kind: output, shape index: {}]  }
   0x1   :  { %11 = vsyncpa [#allocation5], 0  ;;  %s358_s18 = smov [#allocation3]   ;;  %s310_s22 = scalar_lea.hbm %s430_s0, 256 }
   0x2   :  { %s17_s19 = sshll.u32 %s358_s18, 4  ;;  %p311_p0 = scmp.ne.s32.totalorder %s430_s0, %s310_s22  ;;  %s18_s19 = int_to_ptr.vmem [resolvable:$true] %s17_s19 }
   0x3   :  { %p314_p1 = scmp.lt.u32.totalorder %s310_s22, %s430_s0 }
   0x5   :  { %p316_p2 = pnand %p314_p1, %p311_p0 }
   0x7   :  { %319 = shalt.err (!%p316_p2)
}
   0x8   :  { %s320_s27 = scalar_lea.vmem %s18_s19, 256  ;;  %p325_p4 = scmp.lt.s32.totalorder %s18_s19, %s18_s19 }
   0x9   :  { %p321_p3 = scmp.ne.s32.totalorder %s18_s19, %s320_s27  ;;  %p326_p5 = scmp.lt.s32.totalorder %s320_s27, %s320_s27 }
   0xb   :  { %p327_p6 = por %p326_p5, %p325_p4 }
   0xd   :  { %p328_p7 = pnand %p327_p6, %p321_p3 }
   0xf   :  { %331 = shalt.err (!%p328_p7)
}
  0x10   :  { %s359_s28 = smov 128   ;;  %s360_s29 = smov 8  }
  0x11   :  { %23 = dma.hbm_to_vmem [thread:$0]  %s430_s0, 256, %s18_s19, [#allocation4], %s359_s28, %s359_s28, %s360_s29  }
  0x12   :  { %354 = dma.done.wait [#allocation4], 256  }
  0x13   :  { %355 = vsyncadd [#allocation4], 4294967040  ;;  %v361_v0 = vmov 0.0   ;;  %v41_v1 = vld [vmem:[#allocation3] sm:$0xff]  ;;  %v42_v2 = vld [vmem:[#allocation3 + $0x8] sm:$0xff]  ;;  %vm62_vm0 = vcmask 1043456   ;;  %v81_v16 = vlaneseq }
  0x14   :  { %39 = vst [vmem:[#allocation2] sm:$0xf] %v361_v0  ;;  %40 = vst [vmem:[#allocation2 + $0x4] sm:$0xf] %v361_v0  ;;  %290 = vmatprep.subr.mxu0 %v361_v0  ;;  %295 = vmatprep.subr.mxu1 %v361_v0  ;;  %v45_v3 = vrot.slane %v41_v1, 4  ;;  %v46_v4 = vrot.slane %v42_v2, 4 }
  0x15   :  { %v71_v15 = vld [vmem:[%s431_s1] sm:$0xf]  ;;  %vm362_vm1 = vmmov 0   ;;  %v82_v17 = vand.u32 127, %v81_v16  ;;  %v84_v18 = vshrl.u32 %v81_v16, 7  ;;  %vm91_vm2 = vcmask 1041409  }
  0x16   :  { %v49_v7 = vadd.f32 %v45_v3, %v41_v1  ;;  %v50_v8 = vadd.f32 %v46_v4, %v42_v2  ;;  %291 = vmatpush3.msk.msra.mxu0 %vm62_vm0, %v71_v15  ;;  %292 = vmatprep.mubr.msk.f32.mxu0 %vm362_vm1, %v361_v0  ;;  %vm93_vm3 = vcmask 31744   ;;  %v170_v27 = vld [vmem:[%s433_s3] sm:$0x3]  ;;  %vm182_vm4 = vcmask 1041408   ;;  %s363_s3 = smov [#allocation6]  }
  0x17   :  { %297 = vmatprep.mubr.msk.f32.mxu1 %vm362_vm1, %v361_v0  ;;  %v85_v20 = vsub.s32 %v82_v17, %v84_v18  ;;  %296 = vmatpush3.msk.msra.mxu1 %vm182_vm4, %v170_v27  ;;  %v279_v28 = vld [vmem:[%s432_s2] ss:$0 sm:$0xff]  ;;  %vm178_vm5 = vcmask 15360   ;;  %s270_s2 = sshll.u32 %s363_s3, 4  ;;  %vm262_vm6 = vcmask 25600   ;;  %s271_s2 = int_to_ptr.vmem [resolvable:$true] %s270_s2 }
  0x18   :  { %v282_v33 = vld [vmem:[%s434_s4] ss:$0 sm:$0xff]  ;;  %s332_s13 = scalar_lea.vmem %s271_s2, 32  ;;  %p337_p9 = scmp.lt.s32.totalorder %s271_s2, %s271_s2 }
  0x19   :  { %p333_p8 = scmp.ne.s32.totalorder %s271_s2, %s332_s13  ;;  %p338_p10 = scmp.lt.s32.totalorder %s332_s13, %s332_s13 }
  0x1b   :  { %v51_v5 = vld [vmem:[#allocation2] sm:$0xf]  ;;  %v52_v6 = vld [vmem:[#allocation2 + $0x4] sm:$0xf]  ;;  %p339_p11 = por %p338_p10, %p337_p9 }
  0x1c   :  { %v53_v9 = vadd.f32 %v51_v5, %v49_v7  ;;  %v54_v10 = vadd.f32 %v52_v6, %v50_v8 }
  0x1d   :  { %p340_p12 = pnand %p339_p11, %p333_p8 }
  0x1e   :  { %55 = vst [vmem:[#allocation2] sm:$0xf] %v53_v9  ;;  %56 = vst [vmem:[#allocation2 + $0x4] sm:$0xf] %v54_v10 }
  0x25   :  { %v60_v11 = vld [vmem:[#allocation2] sm:$0xf]  ;;  %v61_v12 = vld [vmem:[#allocation2 + $0x4] sm:$0xf] }
  0x26   :  { %v63_v13 = vsel %vm62_vm0, %v60_v11, 0.0  ;;  %v66_v14 = vsel %vm62_vm0, %v61_v12, 0.0 }
  0x27   :  { %64 = vadd.xlane.f32.xlu0 %v63_v13 }
  0x2b   :  { %67 = vadd.xlane.f32.xlu0 %v66_v14 }
  0xb4   :  { %v65_v19 = vpop.xlane.xlu0 %64 }
  0xb5   :  { %v69_v21 = vmul.f32 0.00390625, %v65_v19 }
  0xb7   :  { %v86_v24 = vrot.slane %v69_v21, %v85_v20 }
  0xb8   :  { %v68_v22 = vpop.xlane.xlu0 %67 }
  0xb9   :  { %v70_v23 = vmul.f32 0.00390625, %v68_v22 }
  0xbb   :  { %v90_v25 = vrot.slane %v70_v23, %v85_v20 }
  0xbd   :  { %v92_v26 = vsel %vm91_vm2, %v90_v25, %v86_v24 }
  0xbe   :  { %293 = vmatmul.mubr.msk.f32.vlgmr.msra.gmra.mrb[0].mxu0 %vm93_vm3, %v92_v26 }
 0x191   :  { %v165_v29 = vpop.f32.mrb[0].mxu0 }
 0x192   :  { %v166_v30 = vadd.f32 %v279_v28, %v165_v29  ;;  %v294_v31 = vpop.f32.mrb[1].mxu0 }
 0x194   :  { %v169_v32 = vmax.f32 %v166_v30, 0.0 }
 0x196   :  { %298 = vmatmul.mubr.msk.f32.vlgmr.msra.gmra.mrb[0].mxu1 %vm178_vm5, %v169_v32 }
 0x269   :  { %v252_v34 = vpop.f32.mrb[0].mxu1 }
 0x26a   :  { %v253_v35 = vadd.f32 %v282_v33, %v252_v34  ;;  %v299_v36 = vpop.f32.mrb[1].mxu1 }
 0x26c   :  { %v285_v37 = vmul.f32 -1.442695, %v253_v35 }
 0x26e   :  { %306 = vpow2.f32 %v285_v37 }
 0x278   :  { %v307_v38 = vpop.eup %306 }
 0x279   :  { %v259_v39 = vadd.f32 1.0, %v307_v38 }
 0x27b   :  { %308 = vrcp.f32 %v259_v39 }
 0x285   :  { %v309_v40 = vpop.eup %308 }
 0x286   :  { %263 = vst.msk [vmem:[#allocation6] sm:$0x3] %vm262_vm6, %v309_v40 }
 0x287   :  { %343 = shalt.err (!%p340_p12)
}
 0x288   :  { %s344_s15 = scalar_lea.hbm %s435_s5, 32 }
 0x289   :  { %p345_p13 = scmp.ne.s32.totalorder %s435_s5, %s344_s15  ;;  %p348_p0 = scmp.lt.u32.totalorder %s344_s15, %s435_s5 }
 0x28b   :  { %p350_p1 = pnand %p348_p0, %p345_p13 }
 0x28d   :  { %353 = shalt.err (!%p350_p1)
}
 0x28e   :  { %273 = dma.vmem_to_hbm [thread:$0]  %s271_s2, 32, %s435_s5, [#allocation5]  }
 0x28f   :  { %356 = dma.done.wait [#allocation5], 32  }
 0x290   :  { %357 = vsyncadd [#allocation5], 4294967264 }
 0x291   :  { %277 = vsyncpa [#allocation4], 1 }
 0x292   :  { %278 = vsyncpa [#allocation5], 1 }

</bundles_post_ra>
